<compile_context>
chip_gen: v7x
topology: tpu7x:2x2x1
jax: 0.10.0
libtpu: 0.0.40
codegen_flags: <defaults>
</compile_context>

<pallas_src>
import jax
import jax.numpy as jnp
from jax.experimental import pallas as pl
from jax.experimental.pallas import tpu as pltpu


def _round_up(x: int, m: int) -> int:
    return ((x + m - 1) // m) * m


def _patch_embed_kernel(x_ref, w_ref, b_ref, o_ref):
    """Single MXU matmul + bias per M tile.

    x_ref : VMEM (tm, K)  im2col'd patch rows (compute dtype, e.g. bf16)
    w_ref : VMEM (K, N)   projection weight (resident: constant block index)
    b_ref : VMEM (1, N)   bias (f32, resident)
    o_ref : VMEM (tm, N)  output tile (x.dtype)
    """
    acc = jnp.dot(x_ref[...], w_ref[...], preferred_element_type=jnp.float32)
    o_ref[...] = (acc + b_ref[...]).astype(o_ref.dtype)


def patch_embed_pallas(x, weight, bias, patch_size: int, *,
                       compute_dtype=jnp.bfloat16, tm_target: int = 1024):
    """PatchEmbed.forward: x (B, C, H, W) -> (B, num_patches, embed_dim).

    weight: (embed_dim, C, p, p)  (PyTorch Conv2d layout),  bias: (embed_dim,)
    """
    B, C, H, W = x.shape
    E = weight.shape[0]
    p = patch_size
    gh, gw = H // p, W // p
    num_patches = gh * gw

    # --- im2col (pure layout; allow_input_fusion lets XLA fold it into the DMA) ---
    # (B, C, H, W) -> (B, gh, gw, C, p, p) -> (B*num_patches, C*p*p)
    cols = x.reshape(B, C, gh, p, gw, p)
    cols = cols.transpose(0, 2, 4, 1, 3, 5)
    cols = cols.reshape(B * num_patches, C * p * p)

    # Conv weight (E, C, p, p) -> (C*p*p, E); row ordering matches im2col columns.
    w2d = weight.reshape(E, C * p * p).T
    b2d = bias.reshape(1, E).astype(jnp.float32)

    M, K = cols.shape
    N = E

    # bf16 MXU operands (single-pass matmul), f32 accumulation inside the kernel.
    cols = cols.astype(compute_dtype)
    w2d = w2d.astype(compute_dtype)

    cbytes = jnp.dtype(compute_dtype).itemsize
    obytes = jnp.dtype(x.dtype).itemsize

    # --- tile selection: M-only grid; K and N taken at full extent (weight resident) ---
    tm = min(tm_target, _round_up(M, 16))          # multiple of 16 for bf16 sublane pack
    # Prefer >= 2 M blocks so the "parallel" M axis can shard across v7x's 2 TensorCores.
    if M > 16 and _round_up(M, tm) // tm < 2:
        tm = _round_up((M + 1) // 2, 16)

    # Keep the (double-buffered x, resident weight, double-buffered out) footprint
    # well under v7x's 64 MiB physical VMEM.
    vmem_budget = 40 * 1024 * 1024
    def _footprint(tm_):
        return (2 * tm_ * K * cbytes        # x tiles (double-buffered)
                + 2 * K * N * cbytes        # resident weight (worst case 2 buffers)
                + 2 * tm_ * N * obytes      # output tiles (double-buffered)
                + 2 * N * 4)                # bias
    while tm > 16 and _footprint(tm) > vmem_budget:
        tm = max(16, _round_up(tm // 2, 16))
    # TODO(synk): if K*N alone ever exceeds the VMEM budget (not the case for ViT
    # shapes), a K-split with an accumulator would be needed again.

    Mp = _round_up(M, tm)
    if Mp != M:
        cols = jnp.pad(cols, ((0, Mp - M), (0, 0)))

    grid = (Mp // tm,)
    flops = 2 * M * K * N
    bytes_accessed = M * K * cbytes + K * N * cbytes + M * N * obytes + N * 4

    out = pl.pallas_call(
        _patch_embed_kernel,
        out_shape=jax.ShapeDtypeStruct((Mp, N), x.dtype),
        grid_spec=pltpu.PrefetchScalarGridSpec(
            num_scalar_prefetch=0,
            grid=grid,
            in_specs=[
                pl.BlockSpec((tm, K), lambda i: (i, 0)),   # activations: new tile per step
                pl.BlockSpec((K, N), lambda i: (0, 0)),    # weight: constant -> resident
                pl.BlockSpec((1, N), lambda i: (0, 0)),    # bias:   constant -> resident
            ],
            out_specs=pl.BlockSpec((tm, N), lambda i: (i, 0)),
        ),
        compiler_params=pltpu.CompilerParams(
            dimension_semantics=("parallel",),
            vmem_limit_bytes=48 * 1024 * 1024,
            # Let XLA fold the im2col transpose / pad into the activation input DMA.
            allow_input_fusion=[True, False, False],
        ),
        cost_estimate=pl.CostEstimate(
            flops=flops, transcendentals=0, bytes_accessed=bytes_accessed),
    )(cols, w2d, b2d)

    # Strip M padding, restore (B, num_patches, embed_dim).
    return out[:M].reshape(B, num_patches, N)


if __name__ == "__main__":
    B, C, H, W = 2, 4, 16, 16
    patch_size = 8
    embed_dim = 128
    num_patches = (H // patch_size) * (W // patch_size)

    root = jax.random.PRNGKey(0)
    kx, kw, kb = jax.random.split(root, 3)
    x = jax.random.normal(kx, (B, C, H, W), dtype=jnp.float32)
    weight = 0.02 * jax.random.normal(
        kw, (embed_dim, C, patch_size, patch_size), dtype=jnp.float32)
    bias = 0.02 * jax.random.normal(kb, (embed_dim,), dtype=jnp.float32)

    out = patch_embed_pallas(x, weight, bias, patch_size)
    out = jax.block_until_ready(out)

    # Reference: plain XLA conv mirroring nn.Conv2d(k=stride=patch) + flatten + transpose.
    ref = jax.lax.conv_general_dilated(
        x, weight,
        window_strides=(patch_size, patch_size),
        padding="VALID",
        dimension_numbers=("NCHW", "OIHW", "NCHW"),
        precision=jax.lax.Precision.HIGHEST,
    )
    ref = ref + bias.reshape(1, embed_dim, 1, 1)
    ref = ref.reshape(B, embed_dim, num_patches).transpose(0, 2, 1)

    assert out.shape == (B, num_patches, embed_dim), out.shape
    assert out.dtype == x.dtype, out.dtype
    # Kernel feeds the MXU bf16 operands (f32 accumulation), so compare against the
    # full-precision conv reference with bf16-appropriate tolerances.
    assert jnp.allclose(out, ref, atol=2e-2, rtol=2e-2), float(
        jnp.max(jnp.abs(out - ref)))

    print("KERNEL_OK")
</pallas_src>

<mosaic_0001>
module attributes {stable_mosaic.version = 11 : i64} {
  func.func @_patch_embed_kernel(%arg0: i32, %arg1: memref<16x256xbf16, #tpu.memory_space<vmem>>, %arg2: memref<256x128xbf16, #tpu.memory_space<vmem>>, %arg3: memref<1x128xf32, #tpu.memory_space<vmem>>, %arg4: memref<16x128xf32, #tpu.memory_space<vmem>>) attributes {dimension_semantics = [#tpu.dimension_semantics<parallel>], iteration_bounds = array<i64: 1>, scalar_prefetch = 0 : i64, scratch_operands = 0 : i64, tpu.core_type = #tpu.core_type<tc>, window_params = [{transform_indices = @transform_0, window_bounds = array<i64: 16, 256>}, {pipeline_mode = #tpu.pipeline_mode<synchronous>, transform_indices = @transform_1, window_bounds = array<i64: 256, 128>}, {pipeline_mode = #tpu.pipeline_mode<synchronous>, transform_indices = @transform_2, window_bounds = array<i64: 1, 128>}, {transform_indices = @transform_3, window_bounds = array<i64: 16, 128>}]} {
    %c0 = arith.constant 0 : index
    %c0_0 = arith.constant 0 : index
    %0 = vector.load %arg1[%c0, %c0_0] : memref<16x256xbf16, #tpu.memory_space<vmem>>, vector<16x256xbf16>
    %c0_1 = arith.constant 0 : index
    %c0_2 = arith.constant 0 : index
    %1 = vector.load %arg2[%c0_1, %c0_2] : memref<256x128xbf16, #tpu.memory_space<vmem>>, vector<256x128xbf16>
    %cst = arith.constant dense<0.000000e+00> : vector<16x128xf32>
    %2 = tpu.matmul %0, %1, %cst {dimension_numbers = #tpu.dot_dimension_numbers<[1], [0], [0], [1], [0, 0, 1, 1], [], []>} : vector<16x256xbf16>, vector<256x128xbf16>, vector<16x128xf32> -> vector<16x128xf32>
    %c0_3 = arith.constant 0 : index
    %c0_4 = arith.constant 0 : index
    %3 = vector.load %arg3[%c0_3, %c0_4] : memref<1x128xf32, #tpu.memory_space<vmem>>, vector<1x128xf32>
    %4 = vector.broadcast %3 : vector<1x128xf32> to vector<16x128xf32>
    %5 = arith.addf %2, %4 : vector<16x128xf32>
    %c0_5 = arith.constant 0 : index
    %c0_6 = arith.constant 0 : index
    %6 = vector.load %arg4[%c0_5, %c0_6] : memref<16x128xf32, #tpu.memory_space<vmem>>, vector<16x128xf32>
    tpu.vector_store %arg4[%c0_5, %c0_6], %5 {strides = array<i32>} : memref<16x128xf32, #tpu.memory_space<vmem>>, vector<16x128xf32>,
    return
  }
  func.func @transform_0(%arg0: i32) -> (i32, i32) {
    %c0_i32 = arith.constant 0 : i32
    %c0_i32_0 = arith.constant 0 : i32
    return %arg0, %c0_i32 : i32, i32
  }
  func.func @transform_1(%arg0: i32) -> (i32, i32) {
    %c0_i32 = arith.constant 0 : i32
    %c0_i32_0 = arith.constant 0 : i32
    %c0_i32_1 = arith.constant 0 : i32
    return %c0_i32, %c0_i32_0 : i32, i32
  }
  func.func @transform_2(%arg0: i32) -> (i32, i32) {
    %c0_i32 = arith.constant 0 : i32
    %c0_i32_0 = arith.constant 0 : i32
    %c0_i32_1 = arith.constant 0 : i32
    return %c0_i32, %c0_i32_0 : i32, i32
  }
  func.func @transform_3(%arg0: i32) -> (i32, i32) {
    %c0_i32 = arith.constant 0 : i32
    %c0_i32_0 = arith.constant 0 : i32
    return %arg0, %c0_i32 : i32, i32
  }
}

</mosaic_0001>

<bundles_post_ra>
// kernel: tpu_custom_call.1
= control target key start
LH: loop header
LB: loop body
LE: loop exit
PB: predicated region body
PF: predicated region fallthrough
CT: control target
= control target key end

     0   :  { %8 = vsyncpa [#allocation3], 0  ;;  %s463_s0 = inlined_call_operand.hbm [shape: bf16[16,256], index: 0, kind: input, shape index: {}]   ;;  %s464_s1 = inlined_call_operand.hbm [shape: bf16[256,128], index: 1, kind: input, shape index: {}]   ;;  %s465_s2 = inlined_call_operand.vmem [shape: f32[1,128], index: 2, kind: input, shape index: {}]   ;;  %s466_s3 = inlined_call_operand.hbm [shape: f32[16,128], index: 3, kind: output, shape index: {}]  }
   0x1   :  { %9 = vsyncpa [#allocation6], 0 }
   0x2   :  { %10 = vsyncpa [#allocation4], 0  ;;  %s391_s12 = smov [#allocation2]   ;;  %s319_s16 = scalar_lea.hbm %s463_s0, 256 }
   0x3   :  { %s16_s13 = sshll.u32 %s391_s12, 4  ;;  %p320_p0 = scmp.ne.s32.totalorder %s463_s0, %s319_s16  ;;  %s17_s13 = int_to_ptr.vmem [resolvable:$true] %s16_s13 }
   0x4   :  { %p323_p1 = scmp.lt.u32.totalorder %s319_s16, %s463_s0 }
   0x6   :  { %p325_p2 = pnand %p323_p1, %p320_p0 }
   0x8   :  { %328 = shalt.err (!%p325_p2)
}
   0x9   :  { %s329_s21 = scalar_lea.vmem %s17_s13, 256  ;;  %p334_p4 = scmp.lt.s32.totalorder %s17_s13, %s17_s13 }
   0xa   :  { %p330_p3 = scmp.ne.s32.totalorder %s17_s13, %s329_s21  ;;  %p335_p5 = scmp.lt.s32.totalorder %s329_s21, %s329_s21 }
   0xc   :  { %p336_p6 = por %p335_p5, %p334_p4 }
   0xe   :  { %p337_p7 = pnand %p336_p6, %p330_p3 }
  0x10   :  { %340 = shalt.err (!%p337_p7)
}
  0x11   :  { %s392_s22 = smov 128   ;;  %s393_s23 = smov 8  }
  0x12   :  { %22 = dma.hbm_to_vmem [thread:$0]  %s463_s0, 256, %s17_s13, [#allocation3], %s392_s22, %s392_s22, %s393_s23  }
  0x13   :  { %s394_s26 = smov [#allocation5]   ;;  %s341_s30 = scalar_lea.hbm %s464_s1, 2048 }
  0x14   :  { %s28_s27 = sshll.u32 %s394_s26, 4  ;;  %p342_p8 = scmp.ne.s32.totalorder %s464_s1, %s341_s30  ;;  %s29_s27 = int_to_ptr.vmem [resolvable:$true] %s28_s27 }
  0x15   :  { %p345_p9 = scmp.lt.u32.totalorder %s341_s30, %s464_s1 }
  0x17   :  { %p347_p10 = pnand %p345_p9, %p342_p8 }
  0x19   :  { %350 = shalt.err (!%p347_p10)
}
  0x1a   :  { %s351_s8 = scalar_lea.vmem %s29_s27, 2048  ;;  %p356_p12 = scmp.lt.s32.totalorder %s29_s27, %s29_s27 }
  0x1b   :  { %p352_p11 = scmp.ne.s32.totalorder %s29_s27, %s351_s8  ;;  %p357_p13 = scmp.lt.s32.totalorder %s351_s8, %s351_s8 }
  0x1d   :  { %p358_p0 = por %p357_p13, %p356_p12 }
  0x1f   :  { %p359_p1 = pnand %p358_p0, %p352_p11 }
  0x21   :  { %362 = shalt.err (!%p359_p1)
}
  0x22   :  { %s395_s0 = smov 64   ;;  %s396_s9 = smov 4  }
  0x23   :  { %34 = dma.hbm_to_vmem [thread:$0]  %s464_s1, 2048, %s29_s27, [#allocation6], %s395_s0, %s395_s0, %s396_s9  }
  0x24   :  { %385 = dma.done.wait [#allocation3], 256  }
  0x25   :  { %386 = vsyncadd [#allocation3], 4294967040 }
  0x26   :  { %387 = dma.done.wait [#allocation6], 2048  }
  0x27   :  { %388 = vsyncadd [#allocation6], 4294965248  ;;  %v300_v0 = vld [vmem:[#allocation5 + $0x40] sm:$0xff]   ;;  %v302_v2 = vld [vmem:[#allocation5 + $0x48] sm:$0xff]   ;;  %s397_s13 = smov [#allocation7]  }
  0x28   :  { %v301_v1 = vld [vmem:[#allocation5] sm:$0xff]   ;;  %271 = vmatprep.subr.bf16.mxu0 %v300_v0  ;;  %v303_v3 = vld [vmem:[#allocation5 + $0x8] sm:$0xff]   ;;  %v304_v4 = vld [vmem:[#allocation5 + $0x50] sm:$0xff]   ;;  %s239_s14 = sshll.u32 %s397_s13, 4  ;;  %s240_s14 = int_to_ptr.vmem [resolvable:$true] %s239_s14 }
  0x29   :  { %272 = vmatpush3.bf16.msra.mxu0 %v301_v1  ;;  %v305_v5 = vld [vmem:[#allocation5 + $0x10] sm:$0xff]   ;;  %v306_v6 = vld [vmem:[#allocation5 + $0x58] sm:$0xff]   ;;  %v308_v8 = vld [vmem:[#allocation5 + $0x60] sm:$0xff]   ;;  %s363_s15 = scalar_lea.vmem %s240_s14, 256  ;;  %p368_p3 = scmp.lt.s32.totalorder %s240_s14, %s240_s14 }
  0x2a   :  { %273 = vmatprep.subr.bf16.mxu0 %v302_v2  ;;  %v307_v7 = vld [vmem:[#allocation5 + $0x18] sm:$0xff]   ;;  %v309_v9 = vld [vmem:[#allocation5 + $0x20] sm:$0xff]   ;;  %v310_v10 = vld [vmem:[#allocation5 + $0x68] sm:$0xff]   ;;  %p364_p2 = scmp.ne.s32.totalorder %s240_s14, %s363_s15  ;;  %p369_p4 = scmp.lt.s32.totalorder %s363_s15, %s363_s15 }
  0x2b   :  { %v318_v11 = vld [vmem:[#allocation2 + $0x4] ss:$8 sps:$4 sm:$0xff]   ;;  %v311_v12 = vld [vmem:[#allocation5 + $0x28] sm:$0xff]   ;;  %v316_v17 = vld [vmem:[#allocation2] ss:$8 sps:$4 sm:$0xff]  }
  0x2c   :  { %223 = vmatprep.mubr.bf16.mxu0 %v318_v11  ;;  %v312_v13 = vld [vmem:[#allocation5 + $0x70] sm:$0xff]   ;;  %v314_v15 = vld [vmem:[#allocation5 + $0x78] sm:$0xff]   ;;  %p370_p5 = por %p369_p4, %p368_p3 }
  0x2d   :  { %274 = vmatpush3.bf16.msra.mxu0 %v303_v3  ;;  %v313_v14 = vld [vmem:[#allocation5 + $0x30] sm:$0xff]   ;;  %v315_v16 = vld [vmem:[#allocation5 + $0x38] sm:$0xff]  }
  0x2e   :  { %275 = vmatprep.subr.bf16.mxu0 %v304_v4  ;;  %v252_v19 = vld [vmem:[%s465_s2] ss:$0 sm:$0xff]  ;;  %p371_p6 = pnand %p370_p5, %p364_p2 }
  0x31   :  { %276 = vmatpush3.bf16.msra.mxu0 %v305_v5 }
  0x32   :  { %277 = vmatprep.subr.bf16.mxu0 %v306_v6 }
  0x35   :  { %278 = vmatpush3.bf16.msra.mxu0 %v307_v7 }
  0x36   :  { %279 = vmatprep.subr.bf16.mxu0 %v308_v8 }
  0x39   :  { %280 = vmatpush3.bf16.msra.mxu0 %v309_v9 }
  0x3a   :  { %281 = vmatprep.subr.bf16.mxu0 %v310_v10 }
  0x3d   :  { %282 = vmatpush3.bf16.msra.mxu0 %v311_v12 }
  0x3e   :  { %283 = vmatprep.subr.bf16.mxu0 %v312_v13 }
  0x41   :  { %284 = vmatpush3.bf16.msra.mxu0 %v313_v14 }
  0x42   :  { %285 = vmatprep.subr.bf16.mxu0 %v314_v15 }
  0x45   :  { %286 = vmatpush3.bf16.msra.mxu0 %v315_v16 }
  0x48   :  { %224 = vmatmul.mubr.bf16.vlgmr.msra.gmra.mrb[0].mxu0 %v316_v17 }
 0x11b   :  { %v287_v18 = vpop.f32.mrb[0].mxu0 }
 0x11c   :  { %v288_v20 = vpop.f32.mrb[1].mxu0 }
 0x11d   :  { %v289_v21 = vadd.f32 %v288_v20, %v287_v18  ;;  %v290_v22 = vpop.f32.mrb[2].mxu0 }
 0x11e   :  { %v291_v23 = vpop.f32.mrb[3].mxu0 }
 0x11f   :  { %v226_v24 = vadd.f32 %v289_v21, %v252_v19  ;;  %v292_v25 = vadd.f32 %v291_v23, %v290_v22 }
 0x121   :  { %232 = vst [vmem:[#allocation7] sm:$0xff] %v226_v24  ;;  %v229_v26 = vadd.f32 %v292_v25, %v252_v19 }
 0x123   :  { %233 = vst [vmem:[#allocation7 + $0x8] sm:$0xff] %v229_v26 }
 0x124   :  { %374 = shalt.err (!%p371_p6)
}
 0x125   :  { %s375_s17 = scalar_lea.hbm %s466_s3, 256 }
 0x126   :  { %p376_p7 = scmp.ne.s32.totalorder %s466_s3, %s375_s17  ;;  %p379_p8 = scmp.lt.u32.totalorder %s375_s17, %s466_s3 }
 0x128   :  { %p381_p9 = pnand %p379_p8, %p376_p7 }
 0x12a   :  { %384 = shalt.err (!%p381_p9)
}
 0x12b   :  { %245 = dma.vmem_to_hbm [thread:$0]  %s240_s14, 256, %s466_s3, [#allocation4], %s392_s22, %s392_s22, %s393_s23  }
 0x12c   :  { %389 = dma.done.wait [#allocation4], 256  }
 0x12d   :  { %390 = vsyncadd [#allocation4], 4294967040 }
 0x12e   :  { %249 = vsyncpa [#allocation3], 1 }
 0x12f   :  { %250 = vsyncpa [#allocation6], 1 }
 0x130   :  { %251 = vsyncpa [#allocation4], 1 }

</bundles_post_ra>
